<compile_context>
chip_gen: v5e
topology: v5e:2x2
jax: 0.10.0
libtpu: 0.0.40
codegen_flags: <defaults>
</compile_context>

<pallas_src>
import functools
import numpy as np
import jax
import jax.numpy as jnp
from jax import lax
from jax.experimental import pallas as pl
from jax.experimental.pallas import tpu as pltpu


# ----------------------------------- Pallas kernel ---------------------------------------

def _repvgg_kernel(x_ref, w_ref, b_ref, o_ref, *, Wp, HWo):
    """One (image, Co-tile) step of the fused re-parameterized RepVGG block.

    Layouts (lane axis = flattened spatial, padded row stride Wp = W+2):
      x_ref : (1, Cin, Lp)       spatially pre-padded image, flattened (Lp = (H+2)*Wp + 2)
      w_ref : (tile_co, 9*Cin)   fused weights, K index = (dy*3+dx)*Cin + cin
      b_ref : (tile_co, 1)       fused bias (broadcast over lanes)
      o_ref : (1, tile_co, HWo)  output at row stride Wp; last 2 cols of each row are junk
    """
    x = x_ref[0]                                          # (Cin, Lp)

    # 9 statically-shifted, contiguous, mask-free views stacked along the contraction dim.
    views = [x[:, dy * Wp + dx: dy * Wp + dx + HWo]
             for dy in range(3) for dx in range(3)]       # each (Cin, HWo)
    rhs = jnp.concatenate(views, axis=0)                  # (9*Cin, HWo)

    # Single MXU matmul per grid step; f32 accumulation regardless of operand dtype.
    acc = jnp.dot(w_ref[...], rhs, preferred_element_type=jnp.float32)   # (tile_co, HWo)

    # Bias (one broadcast) + ReLU, written straight to the output tile.
    o_ref[0] = jnp.maximum(acc + b_ref[...], 0.0).astype(o_ref.dtype)


# ----------------------------------- wrapper ----------------------------------------------

def repvgg_block_apply(x_nchw, w_fused, b_fused, *, compute_dtype=jnp.float32):
    """Run the fused RepVGG block. x_nchw:(N,Cin,H,W), w_fused:(Co,Cin,3,3), b_fused:(Co,)."""
    N, Cin, H, W = x_nchw.shape
    Co = w_fused.shape[0]
    Hp, Wp = H + 2, W + 2
    HWo = H * Wp                  # output flattened with the SAME row stride as the padded input
    Lp = Hp * Wp + 2              # +2 so the (dy=2,dx=2) tap's view of the junk columns stays in-bounds

    # Zero-pad spatially once on the host, flatten, and add the 2 trailing zeros.
    x_flat = jnp.pad(x_nchw, ((0, 0), (0, 0), (1, 1), (1, 1))).reshape(N, Cin, Hp * Wp)
    x_flat = jnp.pad(x_flat, ((0, 0), (0, 0), (0, Lp - Hp * Wp))).astype(compute_dtype)

    # (Co, Cin, 3, 3) -> (Co, 9*Cin), K index = (dy*3+dx)*Cin + cin (matches the in-kernel stacking).
    w_mat = jnp.transpose(w_fused, (0, 2, 3, 1)).reshape(Co, 9 * Cin).astype(compute_dtype)
    b_col = b_fused.reshape(Co, 1).astype(jnp.float32)

    # Output-channel tiling for large Co (demo Co fits in one tile).
    tile_co = Co
    for cand in (256, 128, 64):
        if Co > cand and Co % cand == 0:
            tile_co = cand
            break
    grid = (N, Co // tile_co)     # both axes parallel: pipelined, and dual-TC shardable on v7x

    flops = 2 * N * Co * 9 * Cin * HWo + 2 * N * Co * HWo
    bytes_accessed = (x_flat.size * x_flat.dtype.itemsize
                      + w_mat.size * w_mat.dtype.itemsize
                      + b_col.size * 4
                      + N * Co * HWo * 4)

    out_rows = pl.pallas_call(
        functools.partial(_repvgg_kernel, Wp=Wp, HWo=HWo),
        out_shape=jax.ShapeDtypeStruct((N, Co, HWo), jnp.float32),
        grid=grid,
        in_specs=[
            pl.BlockSpec((1, Cin, Lp), lambda n, j: (n, 0, 0)),
            pl.BlockSpec((tile_co, 9 * Cin), lambda n, j: (j, 0)),
            pl.BlockSpec((tile_co, 1), lambda n, j: (j, 0)),
        ],
        out_specs=pl.BlockSpec((1, tile_co, HWo), lambda n, j: (n, j, 0)),
        compiler_params=pltpu.CompilerParams(
            dimension_semantics=("parallel", "parallel")),
        cost_estimate=pl.CostEstimate(flops=flops, transcendentals=0,
                                      bytes_accessed=bytes_accessed),
    )(x_flat, w_mat, b_col)

    # Drop the 2 junk columns per output row: (N, Co, H*Wp) -> (N, Co, H, W).
    return out_rows.reshape(N, Co, H, Wp)[:, :, :, :W]


# -------------------- host-side branch fusion (get_equivalent_kernel_bias) ----------------

def fuse_repvgg_params(w3, bn3, w1, bn1, bnid, eps=1e-5):
    """Fold the three RepVGG branches (eval-mode BN) into one 3x3 kernel + bias."""
    def fold(k, bn):
        gamma, beta, rm, rv = bn
        s = gamma / jnp.sqrt(rv + eps)
        return k * s[:, None, None, None], beta - rm * s

    k3, b3 = fold(w3, bn3)
    k1, b1 = fold(w1, bn1)
    k1 = jnp.pad(k1, ((0, 0), (0, 0), (1, 1), (1, 1)))     # 1x1 -> centered 3x3
    k, b = k3 + k1, b3 + b1
    if bnid is not None:                                    # identity branch (Cin == Co)
        cin = w3.shape[1]
        kid = jnp.zeros((cin, cin, 3, 3), jnp.float32)
        kid = kid.at[jnp.arange(cin), jnp.arange(cin), 1, 1].set(1.0)
        kidf, bid = fold(kid, bnid)
        k, b = k + kidf, b + bid
    return k, b


# ----------------- pure-JAX reference: mirrors the PyTorch eval-mode forward ---------------

def _reference_forward(x, w3, bn3, w1, bn1, bnid, eps=1e-5):
    def bn_apply(y, bn):
        gamma, beta, rm, rv = bn
        s = gamma / jnp.sqrt(rv + eps)
        return (y - rm[None, :, None, None]) * s[None, :, None, None] + beta[None, :, None, None]

    dn = ('NCHW', 'OIHW', 'NCHW')
    y3 = lax.conv_general_dilated(x, w3, (1, 1), ((1, 1), (1, 1)), dimension_numbers=dn)
    y1 = lax.conv_general_dilated(x, w1, (1, 1), ((0, 0), (0, 0)), dimension_numbers=dn)
    out = bn_apply(y3, bn3) + bn_apply(y1, bn1)
    if bnid is not None:
        out = out + bn_apply(x, bnid)
    return jnp.maximum(out, 0.0)


if __name__ == "__main__":
    key = jax.random.PRNGKey(0)

    def make_bn(k, c):
        k1, k2, k3, k4 = jax.random.split(k, 4)
        gamma = 1.0 + 0.1 * jax.random.normal(k1, (c,), jnp.float32)
        beta = 0.05 * jax.random.normal(k2, (c,), jnp.float32)
        rm = 0.1 * jax.random.normal(k3, (c,), jnp.float32)
        rv = jax.random.uniform(k4, (c,), jnp.float32, minval=0.5, maxval=1.5)
        return (gamma, beta, rm, rv)

    def run_case(k, N, Cin, Co, H, W, compute_dtype=jnp.float32, rtol=1e-4, atol=1e-4):
        ks = jax.random.split(k, 6)
        x = jax.random.normal(ks[0], (N, Cin, H, W), jnp.float32)
        w3 = 0.1 * jax.random.normal(ks[1], (Co, Cin, 3, 3), jnp.float32)
        w1 = 0.1 * jax.random.normal(ks[2], (Co, Cin, 1, 1), jnp.float32)
        bn3 = make_bn(ks[3], Co)
        bn1 = make_bn(ks[4], Co)
        bnid = make_bn(ks[5], Cin) if Cin == Co else None   # identity branch iff Cin == Co

        wf, bf = fuse_repvgg_params(w3, bn3, w1, bn1, bnid)
        out = repvgg_block_apply(x, wf, bf, compute_dtype=compute_dtype)
        out = jax.block_until_ready(out)

        ref = _reference_forward(x, w3, bn3, w1, bn1, bnid)
        assert out.shape == (N, Co, H, W)
        np.testing.assert_allclose(np.asarray(out), np.asarray(ref), rtol=rtol, atol=atol)

    k1, k2, k3 = jax.random.split(key, 3)
    run_case(k1, N=2, Cin=8, Co=8, H=16, W=16)    # identity branch present (in == out), f32
    run_case(k2, N=2, Cin=4, Co=8, H=16, W=16)    # no identity branch (in != out), f32
    # bf16 MXU-operand path (the perf-recommended setting on v5e/v6e/v7x); f32 accumulation,
    # tolerance deliberately loosened for the bf16 operand cast.
    run_case(k3, N=2, Cin=8, Co=8, H=16, W=16,
             compute_dtype=jnp.bfloat16, rtol=5e-2, atol=5e-2)

    print("KERNEL_OK")
</pallas_src>

<mosaic_0001>
module attributes {stable_mosaic.version = 11 : i64} {
  func.func @_repvgg_kernel(%arg0: i32, %arg1: i32, %arg2: memref<1x8x326xf32, #tpu.memory_space<vmem>>, %arg3: memref<8x72xf32, #tpu.memory_space<vmem>>, %arg4: memref<8x1xf32, #tpu.memory_space<vmem>>, %arg5: memref<1x8x288xf32, #tpu.memory_space<vmem>>) attributes {dimension_semantics = [#tpu.dimension_semantics<parallel>, #tpu.dimension_semantics<parallel>], iteration_bounds = array<i64: 2, 1>, scalar_prefetch = 0 : i64, scratch_operands = 0 : i64, tpu.core_type = #tpu.core_type<tc>, window_params = [{transform_indices = @transform_0, window_bounds = array<i64: 1, 8, 326>}, {transform_indices = @transform_1, window_bounds = array<i64: 8, 72>}, {transform_indices = @transform_2, window_bounds = array<i64: 8, 1>}, {transform_indices = @transform_3, window_bounds = array<i64: 1, 8, 288>}]} {
    %c0 = arith.constant 0 : index
    %c0_0 = arith.constant 0 : index
    %c0_1 = arith.constant 0 : index
    %0 = vector.load %arg2[%c0, %c0_0, %c0_1] : memref<1x8x326xf32, #tpu.memory_space<vmem>>, vector<1x8x326xf32>
    %1 = vector.shape_cast %0 : vector<1x8x326xf32> to vector<8x326xf32>
    %2 = vector.extract_strided_slice %1 {offsets = [0, 0], sizes = [8, 288], strides = [1, 1]} : vector<8x326xf32> to vector<8x288xf32>
    %3 = vector.extract_strided_slice %1 {offsets = [0, 1], sizes = [8, 288], strides = [1, 1]} : vector<8x326xf32> to vector<8x288xf32>
    %4 = vector.extract_strided_slice %1 {offsets = [0, 2], sizes = [8, 288], strides = [1, 1]} : vector<8x326xf32> to vector<8x288xf32>
    %5 = vector.extract_strided_slice %1 {offsets = [0, 18], sizes = [8, 288], strides = [1, 1]} : vector<8x326xf32> to vector<8x288xf32>
    %6 = vector.extract_strided_slice %1 {offsets = [0, 19], sizes = [8, 288], strides = [1, 1]} : vector<8x326xf32> to vector<8x288xf32>
    %7 = vector.extract_strided_slice %1 {offsets = [0, 20], sizes = [8, 288], strides = [1, 1]} : vector<8x326xf32> to vector<8x288xf32>
    %8 = vector.extract_strided_slice %1 {offsets = [0, 36], sizes = [8, 288], strides = [1, 1]} : vector<8x326xf32> to vector<8x288xf32>
    %9 = vector.extract_strided_slice %1 {offsets = [0, 37], sizes = [8, 288], strides = [1, 1]} : vector<8x326xf32> to vector<8x288xf32>
    %10 = vector.extract_strided_slice %1 {offsets = [0, 38], sizes = [8, 288], strides = [1, 1]} : vector<8x326xf32> to vector<8x288xf32>
    %11 = tpu.concatenate %2, %3, %4, %5, %6, %7, %8, %9, %10 in 0 : vector<8x288xf32>, vector<8x288xf32>, vector<8x288xf32>, vector<8x288xf32>, vector<8x288xf32>, vector<8x288xf32>, vector<8x288xf32>, vector<8x288xf32>, vector<8x288xf32> -> vector<72x288xf32>
    %c0_2 = arith.constant 0 : index
    %c0_3 = arith.constant 0 : index
    %12 = vector.load %arg3[%c0_2, %c0_3] : memref<8x72xf32, #tpu.memory_space<vmem>>, vector<8x72xf32>
    %cst = arith.constant dense<0.000000e+00> : vector<8x288xf32>
    %13 = tpu.matmul %12, %11, %cst {dimension_numbers = #tpu.dot_dimension_numbers<[1], [0], [0], [1], [0, 0, 1, 1], [], []>} : vector<8x72xf32>, vector<72x288xf32>, vector<8x288xf32> -> vector<8x288xf32>
    %c0_4 = arith.constant 0 : index
    %c0_5 = arith.constant 0 : index
    %14 = vector.load %arg4[%c0_4, %c0_5] : memref<8x1xf32, #tpu.memory_space<vmem>>, vector<8x1xf32>
    %15 = vector.broadcast %14 : vector<8x1xf32> to vector<8x288xf32>
    %16 = arith.addf %13, %15 : vector<8x288xf32>
    %cst_6 = arith.constant 0.000000e+00 : f32
    %17 = vector.broadcast %cst_6 : f32 to vector<8x288xf32>
    %18 = arith.maximumf %16, %17 : vector<8x288xf32>
    %c0_7 = arith.constant 0 : index
    %c0_8 = arith.constant 0 : index
    %c0_9 = arith.constant 0 : index
    %19 = vector.load %arg5[%c0_7, %c0_8, %c0_9] : memref<1x8x288xf32, #tpu.memory_space<vmem>>, vector<1x8x288xf32>
    %20 = vector.shape_cast %19 : vector<1x8x288xf32> to vector<8x288xf32>
    %21 = vector.shape_cast %18 : vector<8x288xf32> to vector<1x8x288xf32>
    tpu.vector_store %arg5[%c0_7, %c0_8, %c0_9], %21 {strides = array<i32>} : memref<1x8x288xf32, #tpu.memory_space<vmem>>, vector<1x8x288xf32>,
    return
  }
  func.func @transform_0(%arg0: i32, %arg1: i32) -> (i32, i32, i32) {
    %c0_i32 = arith.constant 0 : i32
    %c0_i32_0 = arith.constant 0 : i32
    %c0_i32_1 = arith.constant 0 : i32
    return %arg0, %c0_i32, %c0_i32_0 : i32, i32, i32
  }
  func.func @transform_1(%arg0: i32, %arg1: i32) -> (i32, i32) {
    %c0_i32 = arith.constant 0 : i32
    %c0_i32_0 = arith.constant 0 : i32
    return %arg1, %c0_i32 : i32, i32
  }
  func.func @transform_2(%arg0: i32, %arg1: i32) -> (i32, i32) {
    %c0_i32 = arith.constant 0 : i32
    %c0_i32_0 = arith.constant 0 : i32
    return %arg1, %c0_i32 : i32, i32
  }
  func.func @transform_3(%arg0: i32, %arg1: i32) -> (i32, i32, i32) {
    %c0_i32 = arith.constant 0 : i32
    %c0_i32_0 = arith.constant 0 : i32
    return %arg0, %arg1, %c0_i32 : i32, i32, i32
  }
}

</mosaic_0001>

<bundles_post_ra>
// kernel: tpu_custom_call.1
= control target key start
LH: loop header
LB: loop body
LE: loop exit
PB: predicated region body
PF: predicated region fallthrough
CT: control target
= control target key end

     0   :  { %8 = vsyncpa [#allocation3], 0  ;;  %s970_s0 = inlined_call_operand.hbm [shape: f32[2,8,326], index: 0, kind: input, shape index: {}]   ;;  %s971_s1 = inlined_call_operand.vmem [shape: f32[8,72], index: 1, kind: input, shape index: {}]   ;;  %s972_s2 = inlined_call_operand.vmem [shape: f32[8,1], index: 2, kind: input, shape index: {}]   ;;  %s973_s3 = inlined_call_operand.hbm [shape: f32[2,8,288], index: 3, kind: output, shape index: {}]  }
   0x1   :  { %10 = vsyncpa [#allocation3 + $0x1], 0 }
   0x2   :  { %11 = vsyncpa [#allocation4], 0 }
   0x3   :  { %13 = vsyncpa [#allocation4 + $0x1], 0  ;;  %s821_s12 = smov 0   ;;  %s823_s13 = smov 0  }
   0x4   :  { %s825_s14 = smov 0   ;;  %s827_s15 = smov 0  }
   0x5   :  { %s829_s16 = smov 0   ;;  %s831_s17 = smov 0  }
   0x6 LB: > { %s547_s18 = sadd.s32 4294967295, %s790_s17   ;;  %s548_s19 = sadd.s32 4294967294, %s790_s17   ;;  %s790_s17 = sphi %s831_s17, %s19_s17   ;;  %s786_s16 = sphi %s829_s16, %s982_s16   ;;  %s782_s15 = sphi %s827_s15, %s981_s15   ;;  %s778_s14 = sphi %s825_s14, %s980_s14   ;;  %s774_s13 = sphi %s823_s13, %s979_s13   ;;  %s770_s12 = sphi %s821_s12, %s978_s12  }
   0x7   : > { %s31_s20 = sadd.s32 1, %s786_s16  ;;  %s38_s21 = sadd.s32 1, %s778_s14 }
   0x8   : > { %p33_p0 = scmp.ge.s32.totalorder %s31_s20, 2  ;;  %p45_p1 = scmp.ne.s32.totalorder %s778_s14, %s774_s13 }
   0x9   : > { %p46_p2 = scmp.eq.s32.totalorder %s790_s17, 0  ;;  %p51_p3 = scmp.ne.s32.totalorder %s774_s13, %s770_s12 }
   0xa   : > { %s984_s20 = smov (%p33_p0, %s31_s20), 0  ;;  %p52_p5 = scmp.eq.s32.totalorder %s547_s18, 0 }
   0xb   : > { %p862_p4 = por %p46_p2, %p45_p1  ;;  %s35_s23 = ssub.s32 %s786_s16, %s984_s20 }
   0xc   : > { %p129_p6 = scmp.eq.s32.totalorder %s547_s18, 1  ;;  %p36_p7 = scmp.eq.s32.totalorder %s35_s23, 0 }
   0xd   : > { %p868_p8 = por %p52_p5, %p51_p3  ;;  %p135_p10 = scmp.eq.s32.totalorder %s548_s19, 1 }
   0xe   : > { %p872_p9 = por %p129_p6, %p45_p1  ;;  %p552_p12 = scmp.ge.s32.totalorder %s790_s17, 2 }
   0xf   : > { %s877_s26 = scalar_select %p36_p7, %s778_s14, %s38_s21  }
  0x10   : > { %p879_p11 = por %p135_p10, %p51_p3  ;;  %p577_p13 = scmp.lt.s32.totalorder %s790_s17, 2 }
  0x11   : > { %s169_s28 = sand.u32 1, %s778_s14   ;;  %s562_s30 = smul.u32 24, %s786_s16 }
  0x12   : > { %s561_s29 = smul.u32 24, %s169_s28  ;;  %p570_p0 = pnand %p577_p13, %p862_p4 }
  0x13   : > { %p554_p2 = scmp.ge.s32.totalorder %s790_s17, 1  ;;  %s178_s6 = scalar_lea.hbm %s970_s0, %s562_s30 }
  0x14   : > { %s173_s7 = scalar_lea.vmem [#allocation2], %s561_s29  ;;  %s180_s9 = sshll.u32 %s178_s6, 4  ;;  %s181_s9 = int_to_ptr.hbm [resolvable:$true] %s180_s9 }
  0x15   : > { %s182_s8 = sshll.u32 %s173_s7, 4  ;;  %s170_s10 = scalar_lea.sflag [#allocation3], %s169_s28  ;;  %s183_s8 = int_to_ptr.vmem [resolvable:$true] %s182_s8 }
  0x16   : > { %572 = dma.hbm_to_vmem [thread:$0]  (!%p570_p0), %s181_s9, 384, %s183_s8, %s170_s10  }
  0x17   : > { %p187_p1 = scmp.lt.s32.totalorder %s790_s17, 3 }
  0x19   : > { %p188_p3 = pnand %p554_p2, %p187_p1 }
  0x1a   : > { %s895_s11 = sand.u32 (!%p188_p3), 1, %s774_s13  }
  0x1b   : > { %191 = sbr.rel (%p188_p3) target bundleno = 329 (0x149), region = 32  ;;  %s194_s19 = scalar_lea.sflag (!%p188_p3), [#allocation3], %s895_s11 }
  0x1c   : > { %s563_s18 = smul.u32 (!%p188_p3), 24, %s895_s11 }
  0x1e   : > { %s197_s21 = scalar_lea.vmem (!%p188_p3), [#allocation2], %s563_s18 }
  0x20   : > { %761 = dma.done.wait (%p868_p8), %s194_s19, 384  }
  0x21   : > { %763 = vsyncadd (%p868_p8), %s194_s19, 4294966912  ;;  %v905_v0 = vld [vmem:[%s197_s21] sm:$0xff]  ;;  %v907_v1 = vld [vmem:[%s197_s21 + $0x10] sm:$0xff]  ;;  %s792_s22 = smov 92   ;;  %s793_s23 = smov 90   ;;  %vm333_vm0 = vcmask 736256  }
  0x22   : > { %v646_v2 = vpack.i.bf16 %v905_v0, %v907_v1  ;;  %s794_s28 = smov 108   ;;  %v911_v3 = vld [vmem:[%s197_s21 + $0x8] sm:$0xff]  ;;  %s795_s29 = smov 91   ;;  %vm321_vm1 = vcmask 744448   ;;  %vm309_vm2 = vcmask 752640   ;;  %v800_v22 = vmov 0  }
  0x23   : > { %s796_s24 = smov 109   ;;  %s797_s30 = smov 110   ;;  %v340_v21 = vld [vmem:[%s972_s2] sm:$0xff]  ;;  %676 = vset.pattern.permute.xlu1 %v800_v22  ;;  %677 = vset.pattern.permute.xlu0 %v800_v22  ;;  %vm297_vm3 = vcmask 883712   ;;  %vm285_vm4 = vcmask 891904   ;;  %vm273_vm5 = vcmask 900096  }
  0x24   : > { %647 = vrot.lane.b32.xlu1 %v646_v2, %s792_s22  ;;  %637 = vrot.lane.b32.xlu0 %v646_v2, %s793_s23  ;;  %s798_s4 = smov 126   ;;  %s799_s5 = smov 127   ;;  %vm261_vm6 = vcmask 1031168   ;;  %v339_v50 = vld [vmem:[%s971_s1] sm:$0xff]  ;;  %vm346_vm7 = vcmask 588800   ;;  %vm249_vm8 = vcmask 1039360  }
  0x25   : > { %652 = vrot.lane.b32.xlu2 %v646_v2, %s794_s28  ;;  %s564_s10 = smul.u32 24, %s782_s15  ;;  %vm415_vm9 = vcmask 261120   ;;  %s418_s15 = scalar_lea.sflag [#allocation4], %s895_s11 }
  0x2c   : > { %329 = vrot.lane.b32.xlu1 %v911_v3, %s793_s23  ;;  %642 = vrot.lane.b32.xlu0 %v646_v2, %s795_s29  ;;  %s228_s23 = scalar_lea.vmem [#allocation5], %s563_s18 }
  0x2d   : > { %317 = vrot.lane.b32.xlu2 %v911_v3, %s795_s29 }
  0x34   : > { %305 = vrot.lane.b32.xlu1 %v911_v3, %s792_s22  ;;  %657 = vrot.lane.b32.xlu0 %v646_v2, %s796_s24  ;;  %s431_s22 = scalar_lea.hbm %s973_s3, %s564_s10 }
  0x35   : > { %662 = vrot.lane.b32.xlu2 %v646_v2, %s797_s30  ;;  %s435_s29 = sshll.u32 %s431_s22, 4  ;;  %s436_s29 = int_to_ptr.hbm [resolvable:$true] %s435_s29 }
  0x3c   : > { %667 = vrot.lane.b32.xlu1 %v646_v2, %s798_s4  ;;  %293 = vrot.lane.b32.xlu0 %v911_v3, %s794_s28  ;;  %s433_s28 = sshll.u32 %s228_s23, 4  ;;  %s434_s28 = int_to_ptr.vmem [resolvable:$true] %s433_s28 }
  0x3d   : > { %281 = vrot.lane.b32.xlu2 %v911_v3, %s796_s24  ;;  %s722_s24 = sshra.s32 %s436_s29, 4  ;;  %s723_s24 = int_to_ptr.hbm [resolvable:$true] %s722_s24 }
  0x3e   : > { %p729_p7 = scmp.lt.s32.totalorder %s723_s24, %s973_s3 }
  0x44   : > { %269 = vrot.lane.b32.xlu1 %v911_v3, %s797_s30  ;;  %672 = vrot.lane.b32.xlu0 %v646_v2, %s799_s5  ;;  %s724_s30 = scalar_lea.hbm %s723_s24, 24 }
  0x45   : > { %257 = vrot.lane.b32.xlu2 %v911_v3, %s798_s4  ;;  %p725_p4 = scmp.ne.s32.totalorder %s723_s24, %s724_s30 }
  0x47   : > { %p726_p5 = pnand %p725_p4, %p872_p9 }
  0x49   : > { %p727_p6 = pneg %p726_p5 }
  0x4c   : > { %245 = vrot.lane.b32.xlu0 %v911_v3, %s799_s5  ;;  %343 = vperm.xlu1 %676, %v340_v21   ;;  %s728_s5 = scalar_lea.hbm %s973_s3, 48 }
  0x4d   : > { %p730_p8 = scmp.lt.s32.totalorder %s728_s5, %s724_s30 }
  0x4f   : > { %p731_p10 = por %p730_p8, %p729_p7 }
  0x51   : > { %p732_p13 = pnand %p731_p10, %p727_p6 }
  0x7f   : > { %v653_v4 = vpop.permute.xlu2 %652 }
  0x80   : > { %v654_v20 = vunpack.i.l.bf16 %v653_v4  ;;  %v655_v30 = vunpack.i.h.bf16 %v653_v4 }
  0x87   : > { %v318_v8 = vpop.permute.xlu2 %317 }
  0x8f   : > { %v663_v19 = vpop.permute.xlu2 %662 }
  0x90   : > { %v664_v29 = vunpack.i.l.bf16 %v663_v19  ;;  %v665_v40 = vunpack.i.h.bf16 %v663_v19 }
  0x96   : > { %v648_v5 = vpop.permute.xlu1 %647  ;;  %v638_v6 = vpop.permute.xlu0 %637 }
  0x97   : > { %v639_v7 = vunpack.i.l.bf16 %v638_v6  ;;  %v640_v9 = vunpack.i.h.bf16 %v638_v6  ;;  %v649_v18 = vunpack.i.l.bf16 %v648_v5  ;;  %v650_v23 = vunpack.i.h.bf16 %v648_v5  ;;  %v282_v32 = vpop.permute.xlu2 %281 }
  0x99   : > { %397 = vmatpush.msra.mxu2 %v639_v7 }
  0x9e   : > { %v330_v10 = vpop.permute.xlu1 %329  ;;  %v643_v11 = vpop.permute.xlu0 %642 }
  0x9f   : > { %v645_v12 = vunpack.i.h.bf16 %v643_v11  ;;  %v334_v13 = vsel %vm333_vm0, %v640_v9, %v330_v10  ;;  %v335_v14 = vsel %vm333_vm0, %v330_v10, %v639_v7  ;;  %v644_v15 = vunpack.i.l.bf16 %v643_v11  ;;  %v258_v42 = vpop.permute.xlu2 %257 }
  0xa0   : > { %357 = vmatpush.msra.mxu0 %v334_v13  ;;  %377 = vmatpush.msra.mxu1 %v335_v14 }
  0xa1   : > { %398 = vmatpush.msra.mxu2 %v644_v15  ;;  %v322_v16 = vsel %vm321_vm1, %v645_v12, %v318_v8  ;;  %v323_v17 = vsel %vm321_vm1, %v318_v8, %v644_v15 }
  0xa2   : > { %358 = vmatpush.msra.mxu0 %v322_v16  ;;  %378 = vmatpush.msra.mxu1 %v323_v17 }
  0xa3   : > { %399 = vmatpush.msra.mxu2 %v649_v18 }
  0xa5   : > { %400 = vmatpush.msra.mxu2 %v654_v20 }
  0xa6   : > { %v306_v24 = vpop.permute.xlu1 %305  ;;  %v658_v25 = vpop.permute.xlu0 %657 }
  0xa7   : > { %v310_v26 = vsel %vm309_vm2, %v650_v23, %v306_v24  ;;  %v311_v27 = vsel %vm309_vm2, %v306_v24, %v649_v18  ;;  %v659_v28 = vunpack.i.l.bf16 %v658_v25  ;;  %v660_v31 = vunpack.i.h.bf16 %v658_v25 }
  0xa8   : > { %359 = vmatpush.msra.mxu0 %v310_v26  ;;  %379 = vmatpush.msra.mxu1 %v311_v27 }
  0xa9   : > { %401 = vmatpush.msra.mxu2 %v659_v28  ;;  %v286_v38 = vsel %vm285_vm4, %v660_v31, %v282_v32  ;;  %v287_v39 = vsel %vm285_vm4, %v282_v32, %v659_v28 }
  0xab   : > { %402 = vmatpush.msra.mxu2 %v664_v29 }
  0xae   : > { %v668_v33 = vpop.permute.xlu1 %667  ;;  %v294_v34 = vpop.permute.xlu0 %293 }
  0xaf   : > { %v298_v35 = vsel %vm297_vm3, %v655_v30, %v294_v34  ;;  %v299_v36 = vsel %vm297_vm3, %v294_v34, %v654_v20  ;;  %v669_v37 = vunpack.i.l.bf16 %v668_v33  ;;  %v670_v41 = vunpack.i.h.bf16 %v668_v33 }
  0xb0   : > { %360 = vmatpush.msra.mxu0 %v298_v35  ;;  %380 = vmatpush.msra.mxu1 %v299_v36 }
  0xb1   : > { %403 = vmatpush.msra.mxu2 %v669_v37  ;;  %v262_v48 = vsel %vm261_vm6, %v670_v41, %v258_v42  ;;  %v263_v49 = vsel %vm261_vm6, %v258_v42, %v669_v37 }
  0xb2   : > { %361 = vmatpush.msra.mxu0 %v286_v38  ;;  %381 = vmatpush.msra.mxu1 %v287_v39 }
  0xb6   : > { %v270_v43 = vpop.permute.xlu1 %269  ;;  %v673_v44 = vpop.permute.xlu0 %672 }
  0xb7   : > { %v274_v45 = vsel %vm273_vm5, %v665_v40, %v270_v43  ;;  %v275_v46 = vsel %vm273_vm5, %v270_v43, %v664_v29  ;;  %v674_v47 = vunpack.i.l.bf16 %v673_v44  ;;  %v675_v51 = vunpack.i.h.bf16 %v673_v44 }
  0xb8   : > { %362 = vmatpush.msra.mxu0 %v274_v45  ;;  %382 = vmatpush.msra.mxu1 %v275_v46 }
  0xb9   : > { %404 = vmatpush.msra.mxu2 %v674_v47 }
  0xba   : > { %363 = vmatpush.msra.mxu0 %v262_v48  ;;  %383 = vmatpush.msra.mxu1 %v263_v49 }
  0xbb   : > { %405 = vmatpush.msra.mxu2 %v907_v1 }
  0xbc   : > { %557 = vmatmul.msk.f32.vlgmr.msra.gmra.mxu2 %vm346_vm7, %v339_v50 }
  0xbe   : > { %v246_v52 = vpop.permute.xlu0 %245  ;;  %v344_v55 = vpop.permute.xlu1 %343 }
  0xbf   : > { %v250_v53 = vsel %vm249_vm8, %v675_v51, %v246_v52  ;;  %v251_v54 = vsel %vm249_vm8, %v246_v52, %v674_v47 }
  0xc0   : > { %364 = vmatpush.msra.mxu0 %v250_v53  ;;  %384 = vmatpush.msra.mxu1 %v251_v54 }
  0xc2   : > { %365 = vmatpush.msra.mxu0 %v905_v0  ;;  %385 = vmatpush.msra.mxu1 %v911_v3 }
  0xc3   : > { %555 = vmatmul.msk.f32.vlgmr.msra.gmra.mxu0 %vm346_vm7, %v339_v50  ;;  %556 = vmatmul.msk.f32.vlgmr.msra.gmra.mxu1 %vm346_vm7, %v339_v50 }
 0x13f   : > { %v407_v56 = vpop.f32.mrf.mxu2 }
 0x140   : > { %v367_v57 = vpop.f32.mrf.mxu0  ;;  %v387_v58 = vpop.f32.mrf.mxu1  ;;  %v408_v59 = vadd.f32 %v407_v56, %v344_v55 }
 0x141   : > { %v368_v60 = vadd.f32 %v367_v57, %v344_v55  ;;  %v388_v61 = vadd.f32 %v387_v58, %v344_v55 }
 0x142   : > { %v412_v62 = vmax.f32 %v408_v59, 0.0 }
 0x143   : > { %v410_v63 = vmax.f32 %v368_v60, 0.0  ;;  %v411_v0 = vmax.f32 %v388_v61, 0.0 }
 0x144   : > { %416 = vst.msk [vmem:[%s228_s23 + $0x10] sm:$0xff] %vm415_vm9, %v412_v62 }
 0x145   : > { %413 = vst [vmem:[%s228_s23] sm:$0xff] %v410_v63 }
 0x146   : > { %414 = vst [vmem:[%s228_s23 + $0x8] sm:$0xff] %v411_v0 }
 0x147   : > { %735 = shalt.err (!%p732_p13)
}
 0x148   : > { %567 = dma.vmem_to_hbm [thread:$0]  (%p872_p9), %s434_s28, 384, %s436_s29, %s418_s15  }
 0x149 PF: > { %s447_s11 = sand.u32 1, %s770_s12   ;;  %p574_p0 = pnand %p552_p12, %p879_p11 }
 0x14a   : > { %s448_s8 = scalar_lea.sflag [#allocation4], %s447_s11 }
 0x14b   : > { %p575_p2 = pneg %p574_p0 }
 0x14d   : > { %765 = dma.done.wait (%p575_p2), %s448_s8, 384  }
 0x14e   : > { %767 = vsyncadd (%p575_p2), %s448_s8, 4294966912  ;;  %s19_s17 = sadd.s32 1, %s790_s17   ;;  %s978_s12 = smov %s774_s13 }
 0x14f   : > { %p16_p1 = scmp.ge.s32.totalorder %s19_s17, 4   ;;  %s979_s13 = smov %s778_s14 }
 0x150   : > { %s980_s14 = smov %s877_s26  ;;  %s981_s15 = smov %s786_s16 }
 0x151   : > { %s982_s16 = smov %s984_s20  ;;  %18 = sbr.rel (!%p16_p1) target bundleno = 6 (0x6), region = 83 }
 0x156   :  { %454 = vsyncpa [#allocation3], 1 }
 0x157   :  { %456 = vsyncpa [#allocation3 + $0x1], 1 }
 0x158   :  { %457 = vsyncpa [#allocation4], 1 }
 0x159   :  { %459 = vsyncpa [#allocation4 + $0x1], 1 }

</bundles_post_ra>
